<compile_context>
chip_gen: v5e
topology: v5e:2x2
jax: 0.10.0
libtpu: 0.0.40
codegen_flags: <defaults>
</compile_context>

<pallas_src>
import math

import jax
import jax.numpy as jnp
from jax.experimental import pallas as pl
from jax.experimental.pallas import tpu as pltpu


# ----------------------------------------------------------------------------
# Kernel
# ----------------------------------------------------------------------------
def _make_kernel(n_steps, n_pairs, unroll_steps):
    """x_ref/o_ref: (TB, TF); A/C: (S, 1, TF); Dw/Db/G: (S, P, TF)."""

    def step_body(x, a_row, c_row, dw_s, db_s, g_s):
        # y = x*A + C + sum_k G_k * relu(x*Dw_k + Db_k)
        y = x * a_row + c_row
        for k in range(n_pairs):
            d = x * dw_s[k:k + 1, :] + db_s[k:k + 1, :]
            y = y + g_s[k:k + 1, :] * jnp.maximum(d, 0.0)
        return x + y

    def kernel(x_ref, a_ref, c_ref, dw_ref, db_ref, g_ref, o_ref):
        x = x_ref[...].astype(jnp.float32)

        def load(s):
            return (a_ref[s].astype(jnp.float32),
                    c_ref[s].astype(jnp.float32),
                    dw_ref[s].astype(jnp.float32),
                    db_ref[s].astype(jnp.float32),
                    g_ref[s].astype(jnp.float32))

        if unroll_steps:
            for s in range(n_steps):
                x = step_body(x, *load(s))
        else:
            # Large S*P: bound live ranges with a real loop; ref[s] is a dynamic
            # leading-axis load.
            x = jax.lax.fori_loop(
                0, n_steps, lambda s, xx: step_body(xx, *load(s)), x)

        o_ref[...] = x.astype(o_ref.dtype)

    return kernel


# ----------------------------------------------------------------------------
# Parameter preprocessing (hoistable, data independent)
# ----------------------------------------------------------------------------
def _coeffs(w1, b1, w2, b2):
    """Fold w2 into the affine terms. Returns A,C:(S,F); Dw,Db,G:(S,P,F)."""
    w1 = w1.astype(jnp.float32)
    b1 = b1.astype(jnp.float32)
    w2 = w2.astype(jnp.float32)
    b2 = b2.astype(jnp.float32)
    w1a, w1b = w1[..., 0::2], w1[..., 1::2]   # (S, F, P)
    b1a, b1b = b1[..., 0::2], b1[..., 1::2]
    w2a, w2b = w2[..., 0::2], w2[..., 1::2]
    A = jnp.sum(w2a * w1a + w2b * w1b, axis=-1)            # (S, F)
    C = jnp.sum(w2a * b1a + w2b * b1b, axis=-1) + b2       # (S, F)
    Dw = jnp.moveaxis(w1a - w1b, -1, 1)                    # (S, P, F)
    Db = jnp.moveaxis(b1a - b1b, -1, 1)
    G = jnp.moveaxis(w2b - w2a, -1, 1)
    return A, C, Dw, Db, G


def _lane_plan(batch, n_features):
    """Return (r, Ff, Fp): batch fold factor, folded width, padded lane width."""
    F = n_features
    if F % 128 == 0:
        return 1, F, F
    # Exact fold: fold r batch rows onto the lane axis so F*r % 128 == 0.
    r_exact = 128 // math.gcd(F, 128)
    if r_exact > 1 and batch % r_exact == 0 and F * r_exact <= 8192:
        return r_exact, F * r_exact, F * r_exact
    # Otherwise fold what fits under 128 lanes, then zero-pad to the next
    # multiple of 128 when the padding overhead is modest (<= 2x).
    r = 1
    if F < 128:
        for cand in range(min(batch, 128 // F), 0, -1):
            if batch % cand == 0:
                r = cand
                break
    Ff = F * r
    Fp = ((Ff + 127) // 128) * 128
    if Fp > 2 * Ff:
        Fp = Ff                     # fall back to masked stores (correct, slower)
    return r, Ff, Fp


def _layout_params(A, C, Dw, Db, G, r, Ff, Fp, dtype=jnp.float32):
    """Lane-dense layout: tile feature axis r times, then zero-pad to Fp."""

    def lane(a):
        a = jnp.tile(a, (1,) * (a.ndim - 1) + (r,))
        if Fp > Ff:
            a = jnp.pad(a, [(0, 0)] * (a.ndim - 1) + [(0, Fp - Ff)])
        return a.astype(dtype)

    A_l = lane(A)[:, None, :]       # (S, 1, Fp)
    C_l = lane(C)[:, None, :]
    Dw_l = lane(Dw)                 # (S, P, Fp)
    Db_l = lane(Db)
    G_l = lane(G)
    return A_l, C_l, Dw_l, Db_l, G_l


def prepare_dist_transform_groupsort(w1, b1, w2, b2, *, batch):
    """One-time parameter preprocessing; hoist this out of the hot path."""
    S, F, U = w1.shape
    assert b1.shape == (S, F, U) and w2.shape == (S, F, U) and b2.shape == (S, F)
    assert U % 2 == 0, "TwoSort pairs adjacent channels; n_units must be even"
    A, C, Dw, Db, G = _coeffs(w1, b1, w2, b2)
    r, Ff, Fp = _lane_plan(batch, F)
    params = _layout_params(A, C, Dw, Db, G, r, Ff, Fp)
    return dict(params=params, S=S, F=F, P=U // 2, r=r, Ff=Ff, Fp=Fp, batch=batch)


# ----------------------------------------------------------------------------
# Tiling policy
# ----------------------------------------------------------------------------
def _vmem_budget_bytes():
    try:
        cap = int(pltpu.get_tpu_info().vmem_capacity_bytes)
    except Exception:
        cap = 64 * 1024 * 1024      # conservative (v7x-sized) fallback
    budget = cap * 3 // 4           # ~48 MiB on v7x, ~96 MiB on v5e/v6e
    return max(32 * 1024 * 1024, min(budget, 100 * 1024 * 1024))


def _pick_feature_tile(Fp, feature_tile, max_tf=2048):
    if feature_tile is not None:
        assert Fp % feature_tile == 0
        assert feature_tile == Fp or feature_tile % 128 == 0
        return feature_tile
    if Fp <= max_tf or Fp % 128 != 0:
        return Fp
    tf = max_tf - (max_tf % 128)
    while tf >= 128 and Fp % tf != 0:
        tf -= 128
    return tf if (tf >= 128 and Fp % tf == 0) else Fp


def _pick_batch_tile(Bf, tf, S, P, budget, itemsize):
    if Bf % 8 != 0:
        return Bf
    # Grid-resident parameters (assume double-buffered, f32).
    param_bytes = (2 * S + 3 * S * P) * tf * 4 * 2
    io_budget = max(budget - param_bytes, 8 * tf * itemsize * 8)
    # Per row: x + out double-buffered, plus ~4 lanes' worth of live f32 temps.
    per_row = tf * (itemsize * 4 + 4 * 4)
    max_rows = max(8, int(io_budget // per_row))
    tb = max(8, min(Bf, (max_rows // 8) * 8))
    while tb > 8 and Bf % tb != 0:
        tb -= 8
    if Bf % tb != 0:
        tb = Bf
    # Split once (helps multi-TensorCore sharding) only when both halves stay
    # large enough (>= ~1 MiB) to amortize the per-grid-step overhead.
    if tb == Bf and (Bf // 2) % 8 == 0 and (Bf // 2) * tf * itemsize >= (1 << 20):
        tb = Bf // 2
    return tb


# ----------------------------------------------------------------------------
# Forward
# ----------------------------------------------------------------------------
def dist_transform_groupsort_prepared(x, prep, *, batch_tile=None, feature_tile=None):
    B, F = x.shape
    assert F == prep["F"] and B == prep["batch"]
    S, P, r, Ff, Fp = prep["S"], prep["P"], prep["r"], prep["Ff"], prep["Fp"]
    A_l, C_l, Dw_l, Db_l, G_l = prep["params"]

    Bf = B // r
    xf = x.reshape(Bf, Ff)
    if Fp > Ff:
        xf = jnp.pad(xf, ((0, 0), (0, Fp - Ff)))

    tf = _pick_feature_tile(Fp, feature_tile)
    budget = _vmem_budget_bytes()
    tb = (_pick_batch_tile(Bf, tf, S, P, budget, xf.dtype.itemsize)
          if batch_tile is None else batch_tile)
    assert Bf % tb == 0 and Fp % tf == 0

    unroll_steps = (S * P) <= 16
    grid = (Bf // tb, Fp // tf)

    out = pl.pallas_call(
        _make_kernel(S, P, unroll_steps),
        out_shape=jax.ShapeDtypeStruct((Bf, Fp), x.dtype),
        grid=grid,
        in_specs=[
            pl.BlockSpec((tb, tf), lambda i, j: (i, j)),        # x
            pl.BlockSpec((S, 1, tf), lambda i, j: (0, 0, j)),   # A
            pl.BlockSpec((S, 1, tf), lambda i, j: (0, 0, j)),   # C
            pl.BlockSpec((S, P, tf), lambda i, j: (0, 0, j)),   # Dw
            pl.BlockSpec((S, P, tf), lambda i, j: (0, 0, j)),   # Db
            pl.BlockSpec((S, P, tf), lambda i, j: (0, 0, j)),   # G
        ],
        out_specs=pl.BlockSpec((tb, tf), lambda i, j: (i, j)),
        compiler_params=pltpu.CompilerParams(
            dimension_semantics=("parallel", "parallel"),
            vmem_limit_bytes=int(budget),
        ),
    )(xf, A_l, C_l, Dw_l, Db_l, G_l)

    if Fp > Ff:
        out = out[:, :Ff]
    return out.reshape(B, F)


def dist_transform_groupsort(x, w1, b1, w2, b2, *, batch_tile=None, feature_tile=None):
    """Convenience wrapper: prepare (hoistable) + apply.

    x  : (B, F)
    w1, b1, w2 : (n_steps, F, U)  effective grouped-1x1-conv parameters
    b2 : (n_steps, F)
    """
    prep = prepare_dist_transform_groupsort(w1, b1, w2, b2, batch=x.shape[0])
    return dist_transform_groupsort_prepared(
        x, prep, batch_tile=batch_tile, feature_tile=feature_tile)


# ----------------------------------------------------------------------------
# Pure-JAX reference (mirrors the PyTorch module, incl. TwoSort via sort)
# ----------------------------------------------------------------------------
def dist_transform_groupsort_ref(x, w1, b1, w2, b2):
    B, F = x.shape
    S, _, U = w1.shape
    out = x
    for s in range(S):
        h = out[:, :, None] * w1[s][None] + b1[s][None]          # (B, F, U)
        hp = h.reshape(B, (F * U) // 2, 2)
        hs = jnp.sort(hp, axis=-1).reshape(B, F, U)              # TwoSort
        y = jnp.sum(hs * w2[s][None], axis=-1) + b2[s][None]
        out = out + y
    return out


# ----------------------------------------------------------------------------
# Self-test
# ----------------------------------------------------------------------------
if __name__ == "__main__":
    key = jax.random.PRNGKey(0)

    def make_params(k, S, F, U):
        k1, k2, k3, k4 = jax.random.split(k, 4)
        w1 = jax.random.normal(k1, (S, F, U), dtype=jnp.float32)
        w1 = 0.9 * w1 / (jnp.linalg.norm(w1, axis=-1, keepdims=True) + 1e-6)
        b1 = 0.01 * jax.random.normal(k2, (S, F, U), dtype=jnp.float32)
        w2 = jax.random.normal(k3, (S, F, U), dtype=jnp.float32)
        w2 = 0.9 * w2 / (jnp.linalg.norm(w2, axis=-1, keepdims=True) + 1e-6)
        b2 = 0.01 * jax.random.normal(k4, (S, F), dtype=jnp.float32)
        return w1, b1, w2, b2

    configs = [
        # (batch, n_features, n_units, n_steps, feature_tile)
        (16,  16,  4, 2, None),    # fold 8 batch rows onto lanes (Ff=128)
        (256, 16,  4, 2, None),    # folded, bigger batch, single large tile
        (16,  128, 2, 1, None),    # F multiple of 128: no fold, P=1
        (64,  48,  4, 2, None),    # exact fold r=8 -> 384 lanes, no padding
        (6,   40,  2, 1, None),    # awkward F: fold r=3 -> 120, pad to 128 lanes
        (32,  256, 12, 3, 128),    # large S*P -> fori_loop path + 2-axis grid
    ]
    for idx, (B, F, U, S, ft) in enumerate(configs):
        kk = jax.random.fold_in(key, idx)
        kx, kp = jax.random.split(kk)
        x = jax.random.normal(kx, (B, F), dtype=jnp.float32)
        w1, b1, w2, b2 = make_params(kp, S, F, U)

        out = dist_transform_groupsort(x, w1, b1, w2, b2, feature_tile=ft)
        out = jax.block_until_ready(out)

        ref = dist_transform_groupsort_ref(x, w1, b1, w2, b2)
        assert out.shape == (B, F)
        assert jnp.allclose(out, ref, atol=1e-5, rtol=1e-4), (
            f"mismatch for config {(B, F, U, S)}: "
            f"max abs err {float(jnp.max(jnp.abs(out - ref)))}")

    print("KERNEL_OK")
</pallas_src>

<mosaic_0001>
module attributes {stable_mosaic.version = 11 : i64} {
  func.func @kernel(%arg0: i32, %arg1: i32, %arg2: memref<2x128xf32, #tpu.memory_space<vmem>>, %arg3: memref<2x1x128xf32, #tpu.memory_space<vmem>>, %arg4: memref<2x1x128xf32, #tpu.memory_space<vmem>>, %arg5: memref<2x2x128xf32, #tpu.memory_space<vmem>>, %arg6: memref<2x2x128xf32, #tpu.memory_space<vmem>>, %arg7: memref<2x2x128xf32, #tpu.memory_space<vmem>>, %arg8: memref<2x128xf32, #tpu.memory_space<vmem>>) attributes {dimension_semantics = [#tpu.dimension_semantics<parallel>, #tpu.dimension_semantics<parallel>], iteration_bounds = array<i64: 1, 1>, scalar_prefetch = 0 : i64, scratch_operands = 0 : i64, tpu.core_type = #tpu.core_type<tc>, window_params = [{transform_indices = @transform_0, window_bounds = array<i64: 2, 128>}, {transform_indices = @transform_1, window_bounds = array<i64: 2, 1, 128>}, {transform_indices = @transform_2, window_bounds = array<i64: 2, 1, 128>}, {transform_indices = @transform_3, window_bounds = array<i64: 2, 2, 128>}, {transform_indices = @transform_4, window_bounds = array<i64: 2, 2, 128>}, {transform_indices = @transform_5, window_bounds = array<i64: 2, 2, 128>}, {transform_indices = @transform_6, window_bounds = array<i64: 2, 128>}]} {
    %c0 = arith.constant 0 : index
    %c0_0 = arith.constant 0 : index
    %0 = vector.load %arg2[%c0, %c0_0] : memref<2x128xf32, #tpu.memory_space<vmem>>, vector<2x128xf32>
    %c0_1 = arith.constant 0 : index
    %c0_2 = arith.constant 0 : index
    %c0_3 = arith.constant 0 : index
    %1 = vector.load %arg3[%c0_1, %c0_2, %c0_3] : memref<2x1x128xf32, #tpu.memory_space<vmem>>, vector<1x1x128xf32>
    %2 = vector.shape_cast %1 : vector<1x1x128xf32> to vector<1x128xf32>
    %c0_4 = arith.constant 0 : index
    %c0_5 = arith.constant 0 : index
    %c0_6 = arith.constant 0 : index
    %3 = vector.load %arg4[%c0_4, %c0_5, %c0_6] : memref<2x1x128xf32, #tpu.memory_space<vmem>>, vector<1x1x128xf32>
    %4 = vector.shape_cast %3 : vector<1x1x128xf32> to vector<1x128xf32>
    %c0_7 = arith.constant 0 : index
    %c0_8 = arith.constant 0 : index
    %c0_9 = arith.constant 0 : index
    %5 = vector.load %arg5[%c0_7, %c0_8, %c0_9] : memref<2x2x128xf32, #tpu.memory_space<vmem>>, vector<1x2x128xf32>
    %6 = vector.shape_cast %5 : vector<1x2x128xf32> to vector<2x128xf32>
    %c0_10 = arith.constant 0 : index
    %c0_11 = arith.constant 0 : index
    %c0_12 = arith.constant 0 : index
    %7 = vector.load %arg6[%c0_10, %c0_11, %c0_12] : memref<2x2x128xf32, #tpu.memory_space<vmem>>, vector<1x2x128xf32>
    %8 = vector.shape_cast %7 : vector<1x2x128xf32> to vector<2x128xf32>
    %c0_13 = arith.constant 0 : index
    %c0_14 = arith.constant 0 : index
    %c0_15 = arith.constant 0 : index
    %9 = vector.load %arg7[%c0_13, %c0_14, %c0_15] : memref<2x2x128xf32, #tpu.memory_space<vmem>>, vector<1x2x128xf32>
    %10 = vector.shape_cast %9 : vector<1x2x128xf32> to vector<2x128xf32>
    %11 = vector.broadcast %2 : vector<1x128xf32> to vector<2x128xf32>
    %12 = arith.mulf %0, %11 : vector<2x128xf32>
    %13 = vector.broadcast %4 : vector<1x128xf32> to vector<2x128xf32>
    %14 = arith.addf %12, %13 : vector<2x128xf32>
    %15 = vector.extract_strided_slice %6 {offsets = [0, 0], sizes = [1, 128], strides = [1, 1]} : vector<2x128xf32> to vector<1x128xf32>
    %16 = vector.broadcast %15 : vector<1x128xf32> to vector<2x128xf32>
    %17 = arith.mulf %0, %16 : vector<2x128xf32>
    %18 = vector.extract_strided_slice %8 {offsets = [0, 0], sizes = [1, 128], strides = [1, 1]} : vector<2x128xf32> to vector<1x128xf32>
    %19 = vector.broadcast %18 : vector<1x128xf32> to vector<2x128xf32>
    %20 = arith.addf %17, %19 : vector<2x128xf32>
    %21 = vector.extract_strided_slice %10 {offsets = [0, 0], sizes = [1, 128], strides = [1, 1]} : vector<2x128xf32> to vector<1x128xf32>
    %cst = arith.constant 0.000000e+00 : f32
    %22 = vector.broadcast %cst : f32 to vector<2x128xf32>
    %23 = arith.maximumf %20, %22 : vector<2x128xf32>
    %24 = vector.broadcast %21 : vector<1x128xf32> to vector<2x128xf32>
    %25 = arith.mulf %24, %23 : vector<2x128xf32>
    %26 = arith.addf %14, %25 : vector<2x128xf32>
    %27 = vector.extract_strided_slice %6 {offsets = [1, 0], sizes = [1, 128], strides = [1, 1]} : vector<2x128xf32> to vector<1x128xf32>
    %28 = vector.broadcast %27 : vector<1x128xf32> to vector<2x128xf32>
    %29 = arith.mulf %0, %28 : vector<2x128xf32>
    %30 = vector.extract_strided_slice %8 {offsets = [1, 0], sizes = [1, 128], strides = [1, 1]} : vector<2x128xf32> to vector<1x128xf32>
    %31 = vector.broadcast %30 : vector<1x128xf32> to vector<2x128xf32>
    %32 = arith.addf %29, %31 : vector<2x128xf32>
    %33 = vector.extract_strided_slice %10 {offsets = [1, 0], sizes = [1, 128], strides = [1, 1]} : vector<2x128xf32> to vector<1x128xf32>
    %cst_16 = arith.constant 0.000000e+00 : f32
    %34 = vector.broadcast %cst_16 : f32 to vector<2x128xf32>
    %35 = arith.maximumf %32, %34 : vector<2x128xf32>
    %36 = vector.broadcast %33 : vector<1x128xf32> to vector<2x128xf32>
    %37 = arith.mulf %36, %35 : vector<2x128xf32>
    %38 = arith.addf %26, %37 : vector<2x128xf32>
    %39 = arith.addf %0, %38 : vector<2x128xf32>
    %c1 = arith.constant 1 : index
    %c0_17 = arith.constant 0 : index
    %c0_18 = arith.constant 0 : index
    %40 = vector.load %arg3[%c1, %c0_17, %c0_18] : memref<2x1x128xf32, #tpu.memory_space<vmem>>, vector<1x1x128xf32>
    %41 = vector.shape_cast %40 : vector<1x1x128xf32> to vector<1x128xf32>
    %c1_19 = arith.constant 1 : index
    %c0_20 = arith.constant 0 : index
    %c0_21 = arith.constant 0 : index
    %42 = vector.load %arg4[%c1_19, %c0_20, %c0_21] : memref<2x1x128xf32, #tpu.memory_space<vmem>>, vector<1x1x128xf32>
    %43 = vector.shape_cast %42 : vector<1x1x128xf32> to vector<1x128xf32>
    %c1_22 = arith.constant 1 : index
    %c0_23 = arith.constant 0 : index
    %c0_24 = arith.constant 0 : index
    %44 = vector.load %arg5[%c1_22, %c0_23, %c0_24] : memref<2x2x128xf32, #tpu.memory_space<vmem>>, vector<1x2x128xf32>
    %45 = vector.shape_cast %44 : vector<1x2x128xf32> to vector<2x128xf32>
    %c1_25 = arith.constant 1 : index
    %c0_26 = arith.constant 0 : index
    %c0_27 = arith.constant 0 : index
    %46 = vector.load %arg6[%c1_25, %c0_26, %c0_27] : memref<2x2x128xf32, #tpu.memory_space<vmem>>, vector<1x2x128xf32>
    %47 = vector.shape_cast %46 : vector<1x2x128xf32> to vector<2x128xf32>
    %c1_28 = arith.constant 1 : index
    %c0_29 = arith.constant 0 : index
    %c0_30 = arith.constant 0 : index
    %48 = vector.load %arg7[%c1_28, %c0_29, %c0_30] : memref<2x2x128xf32, #tpu.memory_space<vmem>>, vector<1x2x128xf32>
    %49 = vector.shape_cast %48 : vector<1x2x128xf32> to vector<2x128xf32>
    %50 = vector.broadcast %41 : vector<1x128xf32> to vector<2x128xf32>
    %51 = arith.mulf %39, %50 : vector<2x128xf32>
    %52 = vector.broadcast %43 : vector<1x128xf32> to vector<2x128xf32>
    %53 = arith.addf %51, %52 : vector<2x128xf32>
    %54 = vector.extract_strided_slice %45 {offsets = [0, 0], sizes = [1, 128], strides = [1, 1]} : vector<2x128xf32> to vector<1x128xf32>
    %55 = vector.broadcast %54 : vector<1x128xf32> to vector<2x128xf32>
    %56 = arith.mulf %39, %55 : vector<2x128xf32>
    %57 = vector.extract_strided_slice %47 {offsets = [0, 0], sizes = [1, 128], strides = [1, 1]} : vector<2x128xf32> to vector<1x128xf32>
    %58 = vector.broadcast %57 : vector<1x128xf32> to vector<2x128xf32>
    %59 = arith.addf %56, %58 : vector<2x128xf32>
    %60 = vector.extract_strided_slice %49 {offsets = [0, 0], sizes = [1, 128], strides = [1, 1]} : vector<2x128xf32> to vector<1x128xf32>
    %cst_31 = arith.constant 0.000000e+00 : f32
    %61 = vector.broadcast %cst_31 : f32 to vector<2x128xf32>
    %62 = arith.maximumf %59, %61 : vector<2x128xf32>
    %63 = vector.broadcast %60 : vector<1x128xf32> to vector<2x128xf32>
    %64 = arith.mulf %63, %62 : vector<2x128xf32>
    %65 = arith.addf %53, %64 : vector<2x128xf32>
    %66 = vector.extract_strided_slice %45 {offsets = [1, 0], sizes = [1, 128], strides = [1, 1]} : vector<2x128xf32> to vector<1x128xf32>
    %67 = vector.broadcast %66 : vector<1x128xf32> to vector<2x128xf32>
    %68 = arith.mulf %39, %67 : vector<2x128xf32>
    %69 = vector.extract_strided_slice %47 {offsets = [1, 0], sizes = [1, 128], strides = [1, 1]} : vector<2x128xf32> to vector<1x128xf32>
    %70 = vector.broadcast %69 : vector<1x128xf32> to vector<2x128xf32>
    %71 = arith.addf %68, %70 : vector<2x128xf32>
    %72 = vector.extract_strided_slice %49 {offsets = [1, 0], sizes = [1, 128], strides = [1, 1]} : vector<2x128xf32> to vector<1x128xf32>
    %cst_32 = arith.constant 0.000000e+00 : f32
    %73 = vector.broadcast %cst_32 : f32 to vector<2x128xf32>
    %74 = arith.maximumf %71, %73 : vector<2x128xf32>
    %75 = vector.broadcast %72 : vector<1x128xf32> to vector<2x128xf32>
    %76 = arith.mulf %75, %74 : vector<2x128xf32>
    %77 = arith.addf %65, %76 : vector<2x128xf32>
    %78 = arith.addf %39, %77 : vector<2x128xf32>
    %c0_33 = arith.constant 0 : index
    %c0_34 = arith.constant 0 : index
    %79 = vector.load %arg8[%c0_33, %c0_34] : memref<2x128xf32, #tpu.memory_space<vmem>>, vector<2x128xf32>
    tpu.vector_store %arg8[%c0_33, %c0_34], %78 {strides = array<i32>} : memref<2x128xf32, #tpu.memory_space<vmem>>, vector<2x128xf32>,
    return
  }
  func.func @transform_0(%arg0: i32, %arg1: i32) -> (i32, i32) {
    %c0_i32 = arith.constant 0 : i32
    return %arg0, %arg1 : i32, i32
  }
  func.func @transform_1(%arg0: i32, %arg1: i32) -> (i32, i32, i32) {
    %c0_i32 = arith.constant 0 : i32
    %c0_i32_0 = arith.constant 0 : i32
    %c0_i32_1 = arith.constant 0 : i32
    return %c0_i32, %c0_i32_0, %arg1 : i32, i32, i32
  }
  func.func @transform_2(%arg0: i32, %arg1: i32) -> (i32, i32, i32) {
    %c0_i32 = arith.constant 0 : i32
    %c0_i32_0 = arith.constant 0 : i32
    %c0_i32_1 = arith.constant 0 : i32
    return %c0_i32, %c0_i32_0, %arg1 : i32, i32, i32
  }
  func.func @transform_3(%arg0: i32, %arg1: i32) -> (i32, i32, i32) {
    %c0_i32 = arith.constant 0 : i32
    %c0_i32_0 = arith.constant 0 : i32
    %c0_i32_1 = arith.constant 0 : i32
    return %c0_i32, %c0_i32_0, %arg1 : i32, i32, i32
  }
  func.func @transform_4(%arg0: i32, %arg1: i32) -> (i32, i32, i32) {
    %c0_i32 = arith.constant 0 : i32
    %c0_i32_0 = arith.constant 0 : i32
    %c0_i32_1 = arith.constant 0 : i32
    return %c0_i32, %c0_i32_0, %arg1 : i32, i32, i32
  }
  func.func @transform_5(%arg0: i32, %arg1: i32) -> (i32, i32, i32) {
    %c0_i32 = arith.constant 0 : i32
    %c0_i32_0 = arith.constant 0 : i32
    %c0_i32_1 = arith.constant 0 : i32
    return %c0_i32, %c0_i32_0, %arg1 : i32, i32, i32
  }
  func.func @transform_6(%arg0: i32, %arg1: i32) -> (i32, i32) {
    %c0_i32 = arith.constant 0 : i32
    return %arg0, %arg1 : i32, i32
  }
}

</mosaic_0001>

<bundles_post_ra>
// kernel: tpu_custom_call.1
= control target key start
LH: loop header
LB: loop body
LE: loop exit
PB: predicated region body
PF: predicated region fallthrough
CT: control target
= control target key end

     0   :  { %11 = vsyncpa [#allocation3], 0  ;;  %s422_s0 = inlined_call_operand.hbm [shape: f32[2,128], index: 0, kind: input, shape index: {}]   ;;  %s423_s1 = inlined_call_operand.hbm [shape: f32[2,1,128], index: 1, kind: input, shape index: {}]   ;;  %s424_s2 = inlined_call_operand.hbm [shape: f32[2,1,128], index: 2, kind: input, shape index: {}]   ;;  %s425_s3 = inlined_call_operand.hbm [shape: f32[2,2,128], index: 3, kind: input, shape index: {}]   ;;  %s426_s4 = inlined_call_operand.hbm [shape: f32[2,2,128], index: 4, kind: input, shape index: {}]   ;;  %s427_s5 = inlined_call_operand.vmem [shape: f32[2,2,128], index: 5, kind: input, shape index: {}]   ;;  %s428_s6 = inlined_call_operand.hbm [shape: f32[2,128], index: 6, kind: output, shape index: {}]  }
   0x1   :  { %12 = vsyncpa [#allocation6], 0 }
   0x2   :  { %13 = vsyncpa [#allocation9], 0  ;;  %s30_s23 = sshll.u32 %s423_s1, 4  ;;  %s31_s23 = int_to_ptr.hbm [resolvable:$true] %s30_s23 }
   0x3   :  { %14 = vsyncpa [#allocation4], 0  ;;  %s353_s24 = smov [#allocation5]   ;;  %s56_s28 = sshll.u32 %s425_s3, 4  ;;  %s57_s28 = int_to_ptr.hbm [resolvable:$true] %s56_s28 }
   0x4   :  { %s32_s25 = sshll.u32 %s353_s24, 4  ;;  %s354_s29 = smov 16   ;;  %s33_s25 = int_to_ptr.vmem [resolvable:$true] %s32_s25 }
   0x5   :  { %s355_s30 = smov 1   ;;  %s356_s7 = smov [#allocation8]  }
   0x6   :  { %38 = dma.hbm_to_vmem [thread:$0]  %s31_s23, 32, %s33_s25, [#allocation6], %s354_s29, %s354_s29, %s355_s30  }
   0x7   :  { %s58_s8 = sshll.u32 %s356_s7, 4  ;;  %s357_s9 = smov 32   ;;  %s59_s8 = int_to_ptr.vmem [resolvable:$true] %s58_s8 }
   0x8   :  { %s358_s10 = smov 2   ;;  %s20_s12 = sshll.u32 %s422_s0, 4  ;;  %s21_s12 = int_to_ptr.hbm [resolvable:$true] %s20_s12 }
   0x9   :  { %64 = dma.hbm_to_vmem [thread:$0]  %s57_s28, 64, %s59_s8, [#allocation9], %s357_s9, %s357_s9, %s358_s10  }
   0xa   :  { %s359_s13 = smov [#allocation2]   ;;  %s43_s16 = sshll.u32 %s424_s2, 4  ;;  %s44_s16 = int_to_ptr.hbm [resolvable:$true] %s43_s16 }
   0xb   :  { %s22_s14 = sshll.u32 %s359_s13, 4  ;;  %s360_s17 = smov [#allocation7]   ;;  %s23_s14 = int_to_ptr.vmem [resolvable:$true] %s22_s14 }
   0xc   :  { %25 = dma.hbm_to_vmem [thread:$0]  %s21_s12, 32, %s23_s14, [#allocation3]  }
   0xd   :  { %s45_s18 = sshll.u32 %s360_s17, 4  ;;  %s69_s21 = sshll.u32 %s426_s4, 4  ;;  %s46_s18 = int_to_ptr.vmem [resolvable:$true] %s45_s18  ;;  %s70_s21 = int_to_ptr.hbm [resolvable:$true] %s69_s21 }
   0xe   :  { %51 = dma.hbm_to_vmem [thread:$0]  %s44_s16, 32, %s46_s18, [#allocation6], %s354_s29, %s354_s29, %s355_s30  }
   0xf   :  { %s361_s0 = smov [#allocation10]  }
  0x10   :  { %s71_s22 = sshll.u32 %s361_s0, 4  ;;  %s72_s22 = int_to_ptr.vmem [resolvable:$true] %s71_s22 }
  0x11   :  { %77 = dma.hbm_to_vmem [thread:$0]  %s70_s21, 64, %s72_s22, [#allocation9], %s357_s9, %s357_s9, %s358_s10  }
  0x12   :  { %345 = dma.done.wait [#allocation3], 32  }
  0x13   :  { %346 = vsyncadd [#allocation3], 4294967264 }
  0x14   :  { %347 = dma.done.wait [#allocation6], 64  }
  0x15   :  { %348 = vsyncadd [#allocation6], 4294967232 }
  0x16   :  { %349 = dma.done.wait [#allocation9], 128  }
  0x17   :  { %350 = vsyncadd [#allocation9], 4294967168  ;;  %v100_v0 = vld [vmem:[#allocation2] sm:$0x3]  ;;  %v103_v1 = vld [vmem:[#allocation8] sm:$0x3] }
  0x18   :  { %v104_v2 = vld [vmem:[#allocation10] sm:$0x3]  ;;  %v197_v3 = vld [vmem:[#allocation5] ss:$0 sm:$0xff]  ;;  %v114_v4 = vperm.slane %v103_v1, 0  ;;  %v122_v7 = vperm.slane %v103_v1, 1 }
  0x19   :  { %v116_v5 = vperm.slane %v104_v2, 0  ;;  %v105_v6 = vld [vmem:[%s427_s5] sm:$0x3]  ;;  %v124_v8 = vperm.slane %v104_v2, 1  ;;  %v109_v9 = vmul.f32 %v197_v3, %v100_v0  ;;  %v198_v10 = vld [vmem:[#allocation7] ss:$0 sm:$0xff] }
  0x1a   :  { %v115_v11 = vmul.f32 %v114_v4, %v100_v0  ;;  %v123_v12 = vmul.f32 %v122_v7, %v100_v0  ;;  %v119_v14 = vperm.slane %v105_v6, 0  ;;  %v127_v16 = vperm.slane %v105_v6, 1  ;;  %v136_v22 = vld [vmem:[#allocation8 + $0x2] sm:$0x3]  ;;  %v138_v24 = vld [vmem:[#allocation10 + $0x2] sm:$0x3] }
  0x1b   :  { %v113_v17 = vadd.f32 %v198_v10, %v109_v9  ;;  %v199_v26 = vld [vmem:[#allocation5 + $0x1] ss:$0 sm:$0xff]  ;;  %v149_v27 = vperm.slane %v136_v22, 0  ;;  %v157_v28 = vperm.slane %v136_v22, 1  ;;  %v151_v30 = vperm.slane %v138_v24, 0  ;;  %s362_s25 = smov [#allocation11]  }
  0x1c   :  { %v117_v13 = vadd.f32 %v116_v5, %v115_v11  ;;  %v125_v15 = vadd.f32 %v124_v8, %v123_v12  ;;  %v159_v31 = vperm.slane %v138_v24, 1  ;;  %v186_v32 = vld [vmem:[%s427_s5 + $0x2] sm:$0x3]  ;;  %v200_v34 = vld [vmem:[#allocation7 + $0x1] ss:$0 sm:$0xff]  ;;  %s172_s26 = sshll.u32 %s362_s25, 4  ;;  %s173_s26 = int_to_ptr.vmem [resolvable:$true] %s172_s26 }
  0x1d   :  { %v154_v38 = vperm.slane %v186_v32, 0  ;;  %v162_v40 = vperm.slane %v186_v32, 1  ;;  %s174_s5 = sshll.u32 %s428_s6, 4  ;;  %s175_s5 = int_to_ptr.hbm [resolvable:$true] %s174_s5 }
  0x1e   :  { %v118_v18 = vmax.f32 %v117_v13, 0.0  ;;  %v126_v19 = vmax.f32 %v125_v15, 0.0 }
  0x20   :  { %v120_v20 = vmul.f32 %v119_v14, %v118_v18  ;;  %v128_v21 = vmul.f32 %v127_v16, %v126_v19 }
  0x22   :  { %v121_v23 = vadd.f32 %v120_v20, %v113_v17 }
  0x24   :  { %v129_v25 = vadd.f32 %v128_v21, %v121_v23 }
  0x26   :  { %v130_v29 = vadd.f32 %v129_v25, %v100_v0 }
  0x28   :  { %v144_v33 = vmul.f32 %v199_v26, %v130_v29  ;;  %v150_v35 = vmul.f32 %v149_v27, %v130_v29  ;;  %v158_v36 = vmul.f32 %v157_v28, %v130_v29 }
  0x2a   :  { %v152_v37 = vadd.f32 %v151_v30, %v150_v35  ;;  %v160_v39 = vadd.f32 %v159_v31, %v158_v36  ;;  %v148_v41 = vadd.f32 %v200_v34, %v144_v33 }
  0x2c   :  { %v153_v42 = vmax.f32 %v152_v37, 0.0  ;;  %v161_v43 = vmax.f32 %v160_v39, 0.0 }
  0x2e   :  { %v155_v44 = vmul.f32 %v154_v38, %v153_v42  ;;  %v163_v45 = vmul.f32 %v162_v40, %v161_v43 }
  0x30   :  { %v156_v46 = vadd.f32 %v155_v44, %v148_v41 }
  0x32   :  { %v164_v47 = vadd.f32 %v163_v45, %v156_v46 }
  0x34   :  { %v165_v48 = vadd.f32 %v164_v47, %v130_v29 }
  0x36   :  { %166 = vst [vmem:[#allocation11] sm:$0x3] %v165_v48 }
  0x37   :  { %177 = dma.vmem_to_hbm [thread:$0]  %s173_s26, 32, %s175_s5, [#allocation4]  }
  0x38   :  { %351 = dma.done.wait [#allocation4], 32  }
  0x39   :  { %352 = vsyncadd [#allocation4], 4294967264 }
  0x3a   :  { %182 = vsyncpa [#allocation3], 1 }
  0x3b   :  { %183 = vsyncpa [#allocation6], 1 }
  0x3c   :  { %184 = vsyncpa [#allocation9], 1 }
  0x3d   :  { %185 = vsyncpa [#allocation4], 1 }

</bundles_post_ra>
